<compile_context>
chip_gen: v5e
topology: v5e:2x2
jax: 0.10.0
libtpu: 0.0.40
codegen_flags: <defaults>
</compile_context>

<pallas_src>
import jax
import jax.numpy as jnp
from jax.experimental import pallas as pl
from jax.experimental.pallas import tpu as pltpu

_TILE_BYTES_CAP = 4 * 1024 * 1024       # target per-tile VMEM footprint
_VMEM_LIMIT_BYTES = 32 * 1024 * 1024    # 2 arrays x 2 buffers x 4 MiB = 16 MiB << 32 MiB


def _chomp_copy_kernel(x_ref, o_ref):
    # Pure aligned tile copy; the BlockSpec window already restricted the input
    # to the kept prefix of the time axis, so the body does no slicing at all.
    o_ref[...] = x_ref[...]


def _round_up(v: int, m: int) -> int:
    return ((v + m - 1) // m) * m


def _choose_tiles(R: int, L_out: int, itemsize: int):
    """Pick (tile_r, tile_l): wide in lanes, short in sublanes (per perf review)."""
    # Sublane packing: f32 -> 8 rows/vreg, bf16 -> 16, int8/fp8 -> 32.
    sublane_align = {4: 8, 2: 16, 1: 32}.get(itemsize, 8)
    r_full = _round_up(R, sublane_align)
    lane_full = _round_up(L_out, 128)   # lane footprint of the full kept axis

    # Preferred: one lane block spanning the whole kept time axis.
    if sublane_align * lane_full * itemsize <= _TILE_BYTES_CAP:
        tile_l = lane_full
        # Capacity-limited row tile.
        tile_r = (_TILE_BYTES_CAP // (lane_full * itemsize)) // sublane_align * sublane_align
        tile_r = max(sublane_align, tile_r)
        # Lane grid is a single block: keep >= ~4 row blocks (when R allows) so
        # both TensorCores on v7x / megacore on v5e-v6e get work.
        row_groups = pl.cdiv(R, sublane_align)
        if row_groups > 1:
            target_blocks = min(4, row_groups)
            tile_r = min(tile_r, _round_up(pl.cdiv(R, target_blocks), sublane_align))
        tile_r = min(tile_r, r_full)
        return tile_r, tile_l

    # Fallback (very long kept axis): lane-tile.  Prefer a tile_l that divides
    # L_out so there is no partial trailing block and no read of the chomped tail.
    max_lanes = max(128, (_TILE_BYTES_CAP // (sublane_align * itemsize)) // 128 * 128)
    tile_l = 0
    if L_out % 128 == 0:
        cand = min(max_lanes, L_out)
        while cand >= 128:
            if L_out % cand == 0:
                tile_l = cand
                break
            cand -= 128
    if tile_l == 0:
        tile_l = min(max_lanes, lane_full)
    tile_r = (_TILE_BYTES_CAP // (tile_l * itemsize)) // sublane_align * sublane_align
    tile_r = max(sublane_align, min(tile_r, r_full))
    return tile_r, tile_l


def chomp1d(x: jax.Array, chomp_size: int) -> jax.Array:
    """Pallas implementation of Chomp1d.forward: x[:, :, :-chomp_size]."""
    if chomp_size < 0:
        raise ValueError("chomp_size must be non-negative")
    if chomp_size == 0:
        # Chomp1d is always built with chomp_size = conv padding > 0; treat 0 as
        # the intended no-op rather than Python's literal `[:, :, :-0]` (empty).
        return x
    N, C, L = x.shape
    L_out = L - chomp_size
    if L_out <= 0:
        raise ValueError("chomp_size must be smaller than the time dimension")

    # Flatten batch and channel into one row dimension: (N, C, L) -> (R, L).
    # Free reshape (contiguous leading dims); the op is now a 2D prefix copy.
    R = N * C
    x2 = x.reshape(R, L)

    itemsize = jnp.dtype(x.dtype).itemsize
    tile_r, tile_l = _choose_tiles(R, L_out, itemsize)
    grid = (pl.cdiv(R, tile_r), pl.cdiv(L_out, tile_l))

    out2 = pl.pallas_call(
        _chomp_copy_kernel,
        out_shape=jax.ShapeDtypeStruct((R, L_out), x.dtype),
        grid_spec=pl.GridSpec(
            grid=grid,
            # The chomp keeps the prefix [0, L_out); identical in/out block
            # indices mean the input window never touches the chomped tail
            # (beyond the <128-column lane pad when L_out % 128 != 0).
            in_specs=[pl.BlockSpec((tile_r, tile_l), lambda i, j: (i, j))],
            out_specs=pl.BlockSpec((tile_r, tile_l), lambda i, j: (i, j)),
        ),
        compiler_params=pltpu.CompilerParams(
            dimension_semantics=("parallel", "parallel"),
            vmem_limit_bytes=_VMEM_LIMIT_BYTES,
        ),
        cost_estimate=pl.CostEstimate(
            flops=0,
            transcendentals=0,
            bytes_accessed=2 * R * L_out * itemsize,
        ),
    )(x2)

    return out2.reshape(N, C, L_out)


if __name__ == "__main__":
    key = jax.random.PRNGKey(0)

    # Small shape consistent with the module (batch, channels, time).
    N, C, L = 2, 4, 16
    chomp_size = 2  # Chomp1d has no weights; this scalar is its only parameter.
    x = jax.random.normal(key, (N, C, L), dtype=jnp.float32)

    y = chomp1d(x, chomp_size)
    y = jax.block_until_ready(y)
    y_ref = x[:, :, :-chomp_size]
    assert y.shape == (N, C, L - chomp_size), y.shape
    assert jnp.array_equal(y, y_ref), "mismatch vs reference slice (small case)"

    # Multiple row blocks + full-time-axis lane block (L_out = 640, multiple of 128).
    k2 = jax.random.PRNGKey(0)
    x2 = jax.random.normal(k2, (2, 8, 700), dtype=jnp.float32)
    y2 = jax.block_until_ready(chomp1d(x2, 60))
    assert jnp.array_equal(y2, x2[:, :, :-60]), "mismatch vs reference slice (tiled case)"

    # bf16 path (sublane packing = 16) with a non-128-multiple kept length.
    k3 = jax.random.PRNGKey(0)
    x3 = jax.random.normal(k3, (2, 8, 96), dtype=jnp.bfloat16)
    y3 = jax.block_until_ready(chomp1d(x3, 32))
    assert jnp.array_equal(y3, x3[:, :, :-32]), "mismatch vs reference slice (bf16 case)"

    print("KERNEL_OK")
</pallas_src>

<mosaic_0001>
module attributes {stable_mosaic.version = 11 : i64} {
  func.func @_chomp_copy_kernel(%arg0: i32, %arg1: i32, %arg2: memref<8x128xf32, #tpu.memory_space<vmem>>, %arg3: memref<8x128xf32, #tpu.memory_space<vmem>>) attributes {dimension_semantics = [#tpu.dimension_semantics<parallel>, #tpu.dimension_semantics<parallel>], iteration_bounds = array<i64: 1, 1>, scalar_prefetch = 0 : i64, scratch_operands = 0 : i64, tpu.core_type = #tpu.core_type<tc>, window_params = [{transform_indices = @transform_0, window_bounds = array<i64: 8, 128>}, {transform_indices = @transform_1, window_bounds = array<i64: 8, 128>}]} {
    %c0 = arith.constant 0 : index
    %c0_0 = arith.constant 0 : index
    %0 = vector.load %arg2[%c0, %c0_0] : memref<8x128xf32, #tpu.memory_space<vmem>>, vector<8x128xf32>
    %c0_1 = arith.constant 0 : index
    %c0_2 = arith.constant 0 : index
    %1 = vector.load %arg3[%c0_1, %c0_2] : memref<8x128xf32, #tpu.memory_space<vmem>>, vector<8x128xf32>
    tpu.vector_store %arg3[%c0_1, %c0_2], %0 {strides = array<i32>} : memref<8x128xf32, #tpu.memory_space<vmem>>, vector<8x128xf32>,
    return
  }
  func.func @transform_0(%arg0: i32, %arg1: i32) -> (i32, i32) {
    %c0_i32 = arith.constant 0 : i32
    return %arg0, %arg1 : i32, i32
  }
  func.func @transform_1(%arg0: i32, %arg1: i32) -> (i32, i32) {
    %c0_i32 = arith.constant 0 : i32
    return %arg0, %arg1 : i32, i32
  }
}

</mosaic_0001>

<bundles_post_ra>
// kernel: tpu_custom_call.1
= control target key start
LH: loop header
LB: loop body
LE: loop exit
PB: predicated region body
PF: predicated region fallthrough
CT: control target
= control target key end

     0   :  { %6 = vsyncpa [#allocation3], 0  ;;  %s114_s0 = inlined_call_operand.hbm [shape: f32[8,16], index: 0, kind: input, shape index: {}]   ;;  %s115_s1 = inlined_call_operand.hbm [shape: f32[8,14], index: 1, kind: output, shape index: {}]  }
   0x1   :  { %7 = vsyncpa [#allocation4], 0  ;;  %s13_s8 = sshll.u32 %s114_s0, 4  ;;  %s96_s9 = smov [#allocation2]   ;;  %s14_s8 = int_to_ptr.hbm [resolvable:$true] %s13_s8 }
   0x2   :  { %s15_s10 = sshll.u32 %s96_s9, 4  ;;  %s16_s10 = int_to_ptr.vmem [resolvable:$true] %s15_s10 }
   0x3   :  { %18 = dma.hbm_to_vmem [thread:$0]  %s14_s8, 128, %s16_s10, [#allocation3]  }
   0x4   :  { %92 = dma.done.wait [#allocation3], 128  }
   0x5   :  { %93 = vsyncadd [#allocation3], 4294967168  ;;  %s97_s11 = smov [#allocation5]   ;;  %s32_s15 = sshll.u32 %s115_s1, 4  ;;  %v23_v0 = vld [vmem:[#allocation2] sm:$0xff]  ;;  %s33_s15 = int_to_ptr.hbm [resolvable:$true] %s32_s15 }
   0x6   :  { %s30_s12 = sshll.u32 %s97_s11, 4  ;;  %24 = vst [vmem:[#allocation5] sm:$0xff] %v23_v0  ;;  %s31_s12 = int_to_ptr.vmem [resolvable:$true] %s30_s12 }
   0x7   :  { %35 = dma.vmem_to_hbm [thread:$0]  %s31_s12, 128, %s33_s15, [#allocation4]  }
   0x8   :  { %94 = dma.done.wait [#allocation4], 128  }
   0x9   :  { %95 = vsyncadd [#allocation4], 4294967168 }
   0xa   :  { %40 = vsyncpa [#allocation3], 1 }
   0xb   :  { %41 = vsyncpa [#allocation4], 1 }

</bundles_post_ra>
